<compile_context>
chip_gen: v7x
topology: tpu7x:2x2x1
jax: 0.10.0
libtpu: 0.0.40
codegen_flags: <defaults>
</compile_context>

<pallas_src>
import jax
import jax.numpy as jnp
from jax.experimental import pallas as pl
from jax.experimental.pallas import tpu as pltpu


# ----------------------------------------------------------------------------
# Kernel
# ----------------------------------------------------------------------------
def _generator_kernel(x_ref, w1_ref, w234_ref, b_ref, o_ref, xpad_ref):
    # x_ref   : (tile2, 2*n_in)   f32   -- two batch rows packed per kernel row
    # w1_ref  : (kpad, 2*n_out)   bf16  -- block-diag(W1, W1), K zero-padded
    # w234_ref: (3, 2*n_out, 2*n_out) bf16 -- block-diag(W2..W4, W2..W4)
    # b_ref   : (4, 1, 2*n_out)   f32   -- [b_i, b_i] per layer
    # o_ref   : (tile2, 2*n_out)  out_dtype (lane-dense, unmasked store)
    # xpad_ref: (tile2, kpad)     bf16  VMEM scratch
    kpair = x_ref.shape[1]
    kpad = xpad_ref.shape[1]

    # In-kernel bf16 cast + zero-extension of K (no wrapper pad/cast passes).
    xpad_ref[:, :kpair] = x_ref[...].astype(jnp.bfloat16)
    if kpad != kpair:  # static Python branch
        xpad_ref[:, kpair:] = jnp.zeros(
            (xpad_ref.shape[0], kpad - kpair), jnp.bfloat16)

    # Layer 1
    h = jnp.dot(xpad_ref[...], w1_ref[...], preferred_element_type=jnp.float32)
    h = h + b_ref[0]
    h = jnp.maximum(h, 0.1 * h)          # leaky_relu(0.1) == max(x, 0.1*x)

    # Layers 2..4 (activation on 2 and 3 only)
    for j in range(3):
        h = jnp.dot(h.astype(jnp.bfloat16), w234_ref[j],
                    preferred_element_type=jnp.float32)
        h = h + b_ref[j + 1]
        if j < 2:
            h = jnp.maximum(h, 0.1 * h)

    o_ref[...] = h.astype(o_ref.dtype)


# ----------------------------------------------------------------------------
# Host-side weight packing (tiny arrays; hoist/cache under jit in practice)
# ----------------------------------------------------------------------------
def _block_diag2(w):
    """(k, n) -> (2k, 2n) block-diagonal duplicate: diag(w, w)."""
    k, n = w.shape
    z = jnp.zeros((k, n), w.dtype)
    top = jnp.concatenate([w, z], axis=1)
    bot = jnp.concatenate([z, w], axis=1)
    return jnp.concatenate([top, bot], axis=0)


def complex_fc_generator(x, params, *, batch_tile=4096, out_dtype=None):
    """Fused 4-layer MLP generator.

    x: (B, n_in) float32
    params: w1..w4 stored as (in_features, out_features), b1..b4 as
            (1, out_features), float32 (kernel computes y = x @ W + b).
    """
    B, n_in = x.shape
    n_out = params["w1"].shape[1]
    out_dtype = x.dtype if out_dtype is None else out_dtype

    # ---- pair packing sizes ----
    kpair = 2 * n_in                       # packed input width (40)
    kpad = ((kpair + 63) // 64) * 64       # MXU-friendly K (64); zeros are free
    n2 = 2 * n_out                         # packed feature width (128 -> lane dense)

    # ---- tile / grid selection ----
    pairs = (B + 1) // 2
    pairs_tile = max(8, batch_tile // 2)
    tile2 = min(pairs_tile, pairs)
    if pairs >= 16:
        # Force >= 2 grid steps when there is enough work so the "parallel"
        # batch axis can shard across both TensorCores on v7x (harmless on 1-TC).
        tile2 = min(tile2, pl.cdiv(pairs, 2))
    tile2 = max(8, ((tile2 + 7) // 8) * 8)
    pairs_pad = pl.cdiv(pairs, tile2) * tile2
    B_pad = 2 * pairs_pad

    # ---- inputs: NO wrapper-side cast/K-pad of x; only pad batch if needed ----
    x_in = x
    if B_pad != B:
        x_in = jnp.pad(x_in, ((0, B_pad - B), (0, 0)))
    x2 = x_in.reshape(pairs_pad, kpair)    # bit-compatible, layout-preserving view

    # ---- weights: block-diag duplicate, K-pad w1, bf16 cast, stack ----
    w1d = _block_diag2(params["w1"])                           # (kpair, n2)
    if kpad != kpair:
        w1d = jnp.pad(w1d, ((0, kpad - kpair), (0, 0)))
    w1p = w1d.astype(jnp.bfloat16)                             # (kpad, n2)
    w234 = jnp.stack([_block_diag2(params[f"w{i}"]).astype(jnp.bfloat16)
                      for i in (2, 3, 4)])                     # (3, n2, n2)
    b_all = jnp.stack([jnp.concatenate(
        [params[f"b{i}"].reshape(1, -1)] * 2, axis=1)
        for i in (1, 2, 3, 4)])                                # (4, 1, n2) f32

    grid = (pairs_pad // tile2,)

    out2 = pl.pallas_call(
        _generator_kernel,
        out_shape=jax.ShapeDtypeStruct((pairs_pad, n2), out_dtype),
        grid_spec=pltpu.PrefetchScalarGridSpec(
            num_scalar_prefetch=0,
            grid=grid,
            in_specs=[
                pl.BlockSpec((tile2, kpair), lambda i: (i, 0)),   # x pair tiles
                pl.BlockSpec(w1p.shape, lambda i: (0, 0)),        # resident weights
                pl.BlockSpec(w234.shape, lambda i: (0, 0, 0)),
                pl.BlockSpec(b_all.shape, lambda i: (0, 0, 0)),
            ],
            out_specs=pl.BlockSpec((tile2, n2), lambda i: (i, 0)),  # lane-dense out
            scratch_shapes=[pltpu.VMEM((tile2, kpad), jnp.bfloat16)],
        ),
        compiler_params=pltpu.CompilerParams(
            dimension_semantics=("parallel",),      # batch axis -> 2 TCs on v7x
            vmem_limit_bytes=32 * 1024 * 1024,
        ),
    )(x2, w1p, w234, b_all)

    out = out2.reshape(B_pad, n_out)       # bit-compatible view back to (B, n_out)
    return out[:B] if B_pad != B else out


# ----------------------------------------------------------------------------
# Init + references
# ----------------------------------------------------------------------------
def init_params(key, n_in, n_out):
    """Deterministic init mimicking nn.Linear's U(-1/sqrt(fan_in), 1/sqrt(fan_in))."""
    keys = jax.random.split(key, 8)
    params = {}
    fan_ins = [n_in, n_out, n_out, n_out]
    for idx, fan_in in enumerate(fan_ins, start=1):
        bound = 1.0 / jnp.sqrt(jnp.float32(fan_in))
        params[f"w{idx}"] = jax.random.uniform(
            keys[2 * (idx - 1)], (fan_in, n_out), jnp.float32,
            minval=-bound, maxval=bound)
        params[f"b{idx}"] = jax.random.uniform(
            keys[2 * (idx - 1) + 1], (1, n_out), jnp.float32,
            minval=-bound, maxval=bound)
    return params


def reference_forward_f32(x, params):
    h = x
    for idx in range(1, 4):
        h = h @ params[f"w{idx}"] + params[f"b{idx}"]
        h = jnp.where(h > 0, h, 0.1 * h)
    return h @ params["w4"] + params["b4"]


def reference_forward_bf16(x, params):
    """Matches the kernel's numerics: bf16 matmul operands, f32 accumulation."""
    h = x.astype(jnp.bfloat16)
    for idx in range(1, 5):
        w = params[f"w{idx}"].astype(jnp.bfloat16)
        h32 = jnp.dot(h, w, preferred_element_type=jnp.float32) + params[f"b{idx}"]
        if idx < 4:
            h32 = jnp.maximum(h32, 0.1 * h32)
            h = h32.astype(jnp.bfloat16)
        else:
            h = h32
    return h


if __name__ == "__main__":
    # Small, consistent shapes: dimension=4, TRIM_LENGTH=14
    #   -> n_out = 4 * (14 // 2 + 1) * 2 = 64
    n_in = 20
    dimension = 4
    trim_length = 14
    n_out = dimension * (trim_length // 2 + 1) * 2  # 64
    batch = 64                                       # -> 32 pair-rows, 2 grid steps

    key = jax.random.PRNGKey(0)
    k_x, k_p = jax.random.split(key)
    x = jax.random.normal(k_x, (batch, n_in), jnp.float32)
    params = init_params(k_p, n_in, n_out)

    out = complex_fc_generator(x, params)
    out = jax.block_until_ready(out)

    assert out.shape == (batch, n_out)

    ref_bf16 = reference_forward_bf16(x, params)
    ref_f32 = reference_forward_f32(x, params)
    assert jnp.allclose(out, ref_bf16, atol=1e-2, rtol=1e-2), \
        "mismatch vs. bf16-matched JAX reference"
    assert jnp.allclose(out, ref_f32, atol=1e-1, rtol=1e-1), \
        "mismatch vs. f32 JAX reference (beyond bf16 error budget)"

    print("KERNEL_OK")
</pallas_src>

<mosaic_0001>
module attributes {stable_mosaic.version = 11 : i64} {
  func.func @_generator_kernel(%arg0: i32, %arg1: memref<16x40xf32, #tpu.memory_space<vmem>>, %arg2: memref<64x128xbf16, #tpu.memory_space<vmem>>, %arg3: memref<3x128x128xbf16, #tpu.memory_space<vmem>>, %arg4: memref<4x1x128xf32, #tpu.memory_space<vmem>>, %arg5: memref<16x128xf32, #tpu.memory_space<vmem>>, %arg6: memref<16x64xbf16, #tpu.memory_space<vmem>>) attributes {dimension_semantics = [#tpu.dimension_semantics<parallel>], iteration_bounds = array<i64: 2>, scalar_prefetch = 0 : i64, scratch_operands = 1 : i64, tpu.core_type = #tpu.core_type<tc>, window_params = [{transform_indices = @transform_0, window_bounds = array<i64: 16, 40>}, {pipeline_mode = #tpu.pipeline_mode<synchronous>, transform_indices = @transform_1, window_bounds = array<i64: 64, 128>}, {pipeline_mode = #tpu.pipeline_mode<synchronous>, transform_indices = @transform_2, window_bounds = array<i64: 3, 128, 128>}, {pipeline_mode = #tpu.pipeline_mode<synchronous>, transform_indices = @transform_3, window_bounds = array<i64: 4, 1, 128>}, {transform_indices = @transform_4, window_bounds = array<i64: 16, 128>}]} {
    %c0 = arith.constant 0 : index
    %c0_0 = arith.constant 0 : index
    %0 = vector.load %arg1[%c0, %c0_0] : memref<16x40xf32, #tpu.memory_space<vmem>>, vector<16x40xf32>
    %1 = arith.truncf %0 : vector<16x40xf32> to vector<16x40xbf16>
    %c0_1 = arith.constant 0 : index
    %c0_2 = arith.constant 0 : index
    %2 = vector.load %arg6[%c0_1, %c0_2] : memref<16x64xbf16, #tpu.memory_space<vmem>>, vector<16x40xbf16>
    tpu.vector_store %arg6[%c0_1, %c0_2], %1 {strides = array<i32>} : memref<16x64xbf16, #tpu.memory_space<vmem>>, vector<16x40xbf16>,
    %cst = arith.constant 0.000000e+00 : bf16
    %3 = vector.broadcast %cst : bf16 to vector<16x24xbf16>
    %c0_3 = arith.constant 0 : index
    %c40 = arith.constant 40 : index
    %4 = vector.load %arg6[%c0_3, %c40] : memref<16x64xbf16, #tpu.memory_space<vmem>>, vector<16x24xbf16>
    tpu.vector_store %arg6[%c0_3, %c40], %3 {strides = array<i32>} : memref<16x64xbf16, #tpu.memory_space<vmem>>, vector<16x24xbf16>,
    %c0_4 = arith.constant 0 : index
    %c0_5 = arith.constant 0 : index
    %5 = vector.load %arg6[%c0_4, %c0_5] : memref<16x64xbf16, #tpu.memory_space<vmem>>, vector<16x64xbf16>
    %c0_6 = arith.constant 0 : index
    %c0_7 = arith.constant 0 : index
    %6 = vector.load %arg2[%c0_6, %c0_7] : memref<64x128xbf16, #tpu.memory_space<vmem>>, vector<64x128xbf16>
    %cst_8 = arith.constant dense<0.000000e+00> : vector<16x128xf32>
    %7 = tpu.matmul %5, %6, %cst_8 {dimension_numbers = #tpu.dot_dimension_numbers<[1], [0], [0], [1], [0, 0, 1, 1], [], []>} : vector<16x64xbf16>, vector<64x128xbf16>, vector<16x128xf32> -> vector<16x128xf32>
    %c0_9 = arith.constant 0 : index
    %c0_10 = arith.constant 0 : index
    %c0_11 = arith.constant 0 : index
    %8 = vector.load %arg4[%c0_9, %c0_10, %c0_11] : memref<4x1x128xf32, #tpu.memory_space<vmem>>, vector<1x1x128xf32>
    %9 = vector.shape_cast %8 : vector<1x1x128xf32> to vector<1x128xf32>
    %10 = vector.broadcast %9 : vector<1x128xf32> to vector<16x128xf32>
    %11 = arith.addf %7, %10 : vector<16x128xf32>
    %cst_12 = arith.constant 1.000000e-01 : f32
    %12 = vector.broadcast %cst_12 : f32 to vector<16x128xf32>
    %13 = arith.mulf %12, %11 : vector<16x128xf32>
    %14 = arith.maximumf %11, %13 : vector<16x128xf32>
    %15 = arith.truncf %14 : vector<16x128xf32> to vector<16x128xbf16>
    %c0_13 = arith.constant 0 : index
    %c0_14 = arith.constant 0 : index
    %c0_15 = arith.constant 0 : index
    %16 = vector.load %arg3[%c0_13, %c0_14, %c0_15] : memref<3x128x128xbf16, #tpu.memory_space<vmem>>, vector<1x128x128xbf16>
    %17 = vector.shape_cast %16 : vector<1x128x128xbf16> to vector<128x128xbf16>
    %cst_16 = arith.constant dense<0.000000e+00> : vector<16x128xf32>
    %18 = tpu.matmul %15, %17, %cst_16 {dimension_numbers = #tpu.dot_dimension_numbers<[1], [0], [0], [1], [0, 0, 1, 1], [], []>} : vector<16x128xbf16>, vector<128x128xbf16>, vector<16x128xf32> -> vector<16x128xf32>
    %c1 = arith.constant 1 : index
    %c0_17 = arith.constant 0 : index
    %c0_18 = arith.constant 0 : index
    %19 = vector.load %arg4[%c1, %c0_17, %c0_18] : memref<4x1x128xf32, #tpu.memory_space<vmem>>, vector<1x1x128xf32>
    %20 = vector.shape_cast %19 : vector<1x1x128xf32> to vector<1x128xf32>
    %21 = vector.broadcast %20 : vector<1x128xf32> to vector<16x128xf32>
    %22 = arith.addf %18, %21 : vector<16x128xf32>
    %cst_19 = arith.constant 1.000000e-01 : f32
    %23 = vector.broadcast %cst_19 : f32 to vector<16x128xf32>
    %24 = arith.mulf %23, %22 : vector<16x128xf32>
    %25 = arith.maximumf %22, %24 : vector<16x128xf32>
    %26 = arith.truncf %25 : vector<16x128xf32> to vector<16x128xbf16>
    %c1_20 = arith.constant 1 : index
    %c0_21 = arith.constant 0 : index
    %c0_22 = arith.constant 0 : index
    %27 = vector.load %arg3[%c1_20, %c0_21, %c0_22] : memref<3x128x128xbf16, #tpu.memory_space<vmem>>, vector<1x128x128xbf16>
    %28 = vector.shape_cast %27 : vector<1x128x128xbf16> to vector<128x128xbf16>
    %cst_23 = arith.constant dense<0.000000e+00> : vector<16x128xf32>
    %29 = tpu.matmul %26, %28, %cst_23 {dimension_numbers = #tpu.dot_dimension_numbers<[1], [0], [0], [1], [0, 0, 1, 1], [], []>} : vector<16x128xbf16>, vector<128x128xbf16>, vector<16x128xf32> -> vector<16x128xf32>
    %c2 = arith.constant 2 : index
    %c0_24 = arith.constant 0 : index
    %c0_25 = arith.constant 0 : index
    %30 = vector.load %arg4[%c2, %c0_24, %c0_25] : memref<4x1x128xf32, #tpu.memory_space<vmem>>, vector<1x1x128xf32>
    %31 = vector.shape_cast %30 : vector<1x1x128xf32> to vector<1x128xf32>
    %32 = vector.broadcast %31 : vector<1x128xf32> to vector<16x128xf32>
    %33 = arith.addf %29, %32 : vector<16x128xf32>
    %cst_26 = arith.constant 1.000000e-01 : f32
    %34 = vector.broadcast %cst_26 : f32 to vector<16x128xf32>
    %35 = arith.mulf %34, %33 : vector<16x128xf32>
    %36 = arith.maximumf %33, %35 : vector<16x128xf32>
    %37 = arith.truncf %36 : vector<16x128xf32> to vector<16x128xbf16>
    %c2_27 = arith.constant 2 : index
    %c0_28 = arith.constant 0 : index
    %c0_29 = arith.constant 0 : index
    %38 = vector.load %arg3[%c2_27, %c0_28, %c0_29] : memref<3x128x128xbf16, #tpu.memory_space<vmem>>, vector<1x128x128xbf16>
    %39 = vector.shape_cast %38 : vector<1x128x128xbf16> to vector<128x128xbf16>
    %cst_30 = arith.constant dense<0.000000e+00> : vector<16x128xf32>
    %40 = tpu.matmul %37, %39, %cst_30 {dimension_numbers = #tpu.dot_dimension_numbers<[1], [0], [0], [1], [0, 0, 1, 1], [], []>} : vector<16x128xbf16>, vector<128x128xbf16>, vector<16x128xf32> -> vector<16x128xf32>
    %c3 = arith.constant 3 : index
    %c0_31 = arith.constant 0 : index
    %c0_32 = arith.constant 0 : index
    %41 = vector.load %arg4[%c3, %c0_31, %c0_32] : memref<4x1x128xf32, #tpu.memory_space<vmem>>, vector<1x1x128xf32>
    %42 = vector.shape_cast %41 : vector<1x1x128xf32> to vector<1x128xf32>
    %43 = vector.broadcast %42 : vector<1x128xf32> to vector<16x128xf32>
    %44 = arith.addf %40, %43 : vector<16x128xf32>
    %c0_33 = arith.constant 0 : index
    %c0_34 = arith.constant 0 : index
    %45 = vector.load %arg5[%c0_33, %c0_34] : memref<16x128xf32, #tpu.memory_space<vmem>>, vector<16x128xf32>
    tpu.vector_store %arg5[%c0_33, %c0_34], %44 {strides = array<i32>} : memref<16x128xf32, #tpu.memory_space<vmem>>, vector<16x128xf32>,
    return
  }
  func.func @transform_0(%arg0: i32) -> (i32, i32) {
    %c0_i32 = arith.constant 0 : i32
    %c0_i32_0 = arith.constant 0 : i32
    return %arg0, %c0_i32 : i32, i32
  }
  func.func @transform_1(%arg0: i32) -> (i32, i32) {
    %c0_i32 = arith.constant 0 : i32
    %c0_i32_0 = arith.constant 0 : i32
    %c0_i32_1 = arith.constant 0 : i32
    return %c0_i32, %c0_i32_0 : i32, i32
  }
  func.func @transform_2(%arg0: i32) -> (i32, i32, i32) {
    %c0_i32 = arith.constant 0 : i32
    %c0_i32_0 = arith.constant 0 : i32
    %c0_i32_1 = arith.constant 0 : i32
    %c0_i32_2 = arith.constant 0 : i32
    return %c0_i32, %c0_i32_0, %c0_i32_1 : i32, i32, i32
  }
  func.func @transform_3(%arg0: i32) -> (i32, i32, i32) {
    %c0_i32 = arith.constant 0 : i32
    %c0_i32_0 = arith.constant 0 : i32
    %c0_i32_1 = arith.constant 0 : i32
    %c0_i32_2 = arith.constant 0 : i32
    return %c0_i32, %c0_i32_0, %c0_i32_1 : i32, i32, i32
  }
  func.func @transform_4(%arg0: i32) -> (i32, i32) {
    %c0_i32 = arith.constant 0 : i32
    %c0_i32_0 = arith.constant 0 : i32
    return %arg0, %c0_i32 : i32, i32
  }
}

</mosaic_0001>

<bundles_post_ra>
// kernel: tpu_custom_call.1
= control target key start
LH: loop header
LB: loop body
LE: loop exit
PB: predicated region body
PF: predicated region fallthrough
CT: control target
= control target key end

     0   :  { %9 = vsyncpa [#allocation4], 0  ;;  %s1550_s0 = inlined_call_operand.hbm [shape: f32[32,40], index: 0, kind: input, shape index: {}]   ;;  %s1551_s1 = inlined_call_operand.hbm [shape: bf16[64,128], index: 1, kind: input, shape index: {}]   ;;  %s1552_s2 = inlined_call_operand.hbm [shape: bf16[3,128,128], index: 2, kind: input, shape index: {}]   ;;  %s1553_s3 = inlined_call_operand.vmem [shape: f32[4,1,128], index: 3, kind: input, shape index: {}]   ;;  %s1554_s4 = inlined_call_operand.hbm [shape: f32[32,128], index: 4, kind: output, shape index: {}]  }
   0x1   :  { %11 = vsyncpa [#allocation4 + $0x1], 0 }
   0x2   :  { %12 = vsyncpa [#allocation7], 0 }
   0x3   :  { %13 = vsyncpa [#allocation5], 0 }
   0x4   :  { %15 = vsyncpa [#allocation5 + $0x1], 0  ;;  %s1264_s15 = smov 0   ;;  %s1266_s16 = smov 0  }
   0x5   :  { %s1268_s17 = smov 0   ;;  %s1270_s18 = smov 0  }
   0x6 LB: > { %s1285_s19 = sadd.s32 4294967295, %s1224_s18   ;;  %s804_s20 = sadd.s32 4294967294, %s1224_s18   ;;  %s1224_s18 = sphi %s1270_s18, %s1574_s18   ;;  %s1220_s17 = sphi %s1268_s17, %s1573_s17   ;;  %s1216_s16 = sphi %s1266_s16, %s1572_s16   ;;  %s1212_s15 = sphi %s1264_s15, %s1571_s15  }
   0x7   : > { %p41_p0 = scmp.ne.s32.totalorder %s1216_s16, %s1212_s15  ;;  %p1555_p1 = scmp.eq.s32.totalorder %s1285_s19, 0 }
   0x8   : > { %p134_p3 = scmp.eq.s32.totalorder %s804_s20, 1  ;;  %p805_p5 = scmp.ge.s32.totalorder %s1224_s18, 1 }
   0x9   : > { %p1294_p4 = por %p1555_p1, %p41_p0  ;;  %p141_p7 = scmp.lt.s32.totalorder %s1224_s18, 3 }
   0xa   : > { %p1299_p6 = por %p134_p3, %p41_p0  ;;  %s1226_s24 = smov [#allocation6]  }
   0xb   : > { %s1558_s21 = scalar_select %p1294_p4, 1, 0 }
   0xc   : > { %s1559_s22 = scalar_select %p1299_p6, 1, 0 }
   0xd   : > { %p1304_p8 = pnand %p805_p5, %p141_p7  ;;  %s153_s25 = sshll.u32 %s1226_s24, 4  ;;  %s1308_s25 = int_to_ptr.vmem [resolvable:$true] %s153_s25 }
   0xe   : > { %s1227_s27 = smov [#allocation8]   ;;  %s1068_s5 = scalar_lea.hbm %s1551_s1, 512 }
   0xf   : > { %p976_p9 = pneg %p1304_p8  ;;  %s166_s28 = sshll.u32 %s1227_s27, 4  ;;  %s1319_s28 = int_to_ptr.vmem [resolvable:$true] %s166_s28 }
  0x10   : > { %p1069_p12 = scmp.ne.s32.totalorder %s1551_s1, %s1068_s5  ;;  %p1075_p5 = scmp.lt.u32.totalorder %s1068_s5, %s1551_s1 }
  0x11   : > { %p1315_p11 = pnand %p976_p9, %p1555_p1 }
  0x13   : > { %p1070_p13 = pneg %p1315_p11 }
  0x15   : > { %p1071_p0 = pnand %p1070_p13, %p1069_p12 }
  0x17   : > { %p1072_p3 = pneg %p1071_p0 }
  0x19   : > { %p1077_p7 = pnand %p1075_p5, %p1072_p3 }
  0x1b   : > { %1080 = shalt.err (!%p1077_p7)
}
  0x1c   : > { %s1081_s10 = scalar_lea.vmem %s1308_s25, 512  ;;  %p1089_p2 = scmp.lt.s32.totalorder %s1308_s25, %s1308_s25 }
  0x1d   : > { %p1082_p9 = scmp.ne.s32.totalorder %s1308_s25, %s1081_s10  ;;  %p1090_p12 = scmp.lt.s32.totalorder %s1081_s10, %s1081_s10 }
  0x1f   : > { %p1084_p10 = pnand %p1082_p9, %p1070_p13  ;;  %p1091_p0 = por %p1090_p12, %p1089_p2 }
  0x21   : > { %p1085_p1 = pneg %p1084_p10 }
  0x23   : > { %p1092_p6 = pnand %p1091_p0, %p1085_p1 }
  0x25   : > { %1095 = shalt.err (!%p1092_p6)
}
  0x26   : > { %s1228_s11 = smov 64   ;;  %s1229_s12 = smov 4  }
  0x27   : > { %979 = dma.hbm_to_vmem [thread:$0]  (!%p1315_p11), %s1551_s1, 512, %s1308_s25, [#allocation7], %s1228_s11, %s1228_s11, %s1229_s12  }
  0x28   : > { %s1096_s27 = scalar_lea.hbm %s1552_s2, 3072 }
  0x29   : > { %p1097_p2 = scmp.ne.s32.totalorder %s1552_s2, %s1096_s27  ;;  %p1103_p10 = scmp.lt.u32.totalorder %s1096_s27, %s1552_s2 }
  0x2b   : > { %p1099_p1 = pnand %p1097_p2, %p1070_p13 }
  0x2d   : > { %p1100_p6 = pneg %p1099_p1 }
  0x2f   : > { %p1105_p3 = pnand %p1103_p10, %p1100_p6 }
  0x31   : > { %1108 = shalt.err (!%p1105_p3)
}
  0x32   : > { %s1109_s25 = scalar_lea.vmem %s1319_s28, 3072  ;;  %p1117_p12 = scmp.lt.s32.totalorder %s1319_s28, %s1319_s28 }
  0x33   : > { %p1110_p5 = scmp.ne.s32.totalorder %s1319_s28, %s1109_s25  ;;  %p1118_p0 = scmp.lt.s32.totalorder %s1109_s25, %s1109_s25 }
  0x35   : > { %p1112_p7 = pnand %p1110_p5, %p1070_p13  ;;  %p1119_p2 = por %p1118_p0, %p1117_p12 }
  0x37   : > { %p1113_p9 = pneg %p1112_p7 }
  0x39   : > { %p1120_p1 = pnand %p1119_p2, %p1113_p9 }
  0x3b   : > { %1123 = shalt.err (!%p1120_p1)
}
  0x3c   : > { %982 = dma.hbm_to_vmem [thread:$0]  (!%p1315_p11), %s1552_s2, 3072, %s1319_s28, [#allocation7], %s1228_s11, %s1228_s11, %s1229_s12  }
  0x3d   : > { %s1374_s9 = sadd.s32 1, %s1224_s18   ;;  %s28_s26 = sadd.s32 1, %s1220_s17 }
  0x3e   : > { %s25_s10 = ssub.s32 %s1224_s18, %s1374_s9  ;;  %p35_p13 = scmp.ne.s32.totalorder %s1220_s17, %s1216_s16 }
  0x3f   : > { %p26_p6 = scmp.eq.s32.totalorder %s25_s10, 0  ;;  %p36_p10 = scmp.eq.s32.totalorder %s1224_s18, 0 }
  0x40   : > { %p1562_p3 = scmp.eq.s32.totalorder %s1285_s19, 1  ;;  %p993_p7 = scmp.lt.s32.totalorder %s1224_s18, 2 }
  0x41   : > { %s1390_s14 = scalar_select %p26_p6, %s1220_s17, %s28_s26  }
  0x42   : > { %p1384_p5 = por %p1562_p3, %p35_p13  ;;  %p37_p9 = por %p36_p10, %p35_p13 }
  0x43   : > { %s183_s20 = sand.u32 1, %s1220_s17   ;;  %s858_s28 = sshll.u32 %s1224_s18, 8 }
  0x44   : > { %s1563_s13 = scalar_select %p1384_p5, 1, 0 }
  0x45   : > { %s809_s24 = sshll.u32 %s183_s20, 4  ;;  %s1397_s27 = scalar_lea.hbm %s1550_s0, %s858_s28 }
  0x46   : > { %s187_s29 = scalar_lea.vmem [#allocation3], %s809_s24  ;;  %p1401_p11 = pnand %p993_p7, %p37_p9 }
  0x47   : > { %s194_s30 = sshll.u32 %s187_s29, 4  ;;  %s1405_s6 = scalar_lea.sflag [#allocation4], %s183_s20  ;;  %s1399_s30 = int_to_ptr.vmem [resolvable:$true] %s194_s30 }
  0x48   : > { %s1124_s25 = scalar_lea.hbm %s1397_s27, 256  ;;  %p1126_p0 = pneg %p1401_p11 }
  0x49   : > { %p1125_p12 = scmp.ne.s32.totalorder %s1397_s27, %s1124_s25  ;;  %s1129_s26 = scalar_lea.hbm %s1550_s0, 512 }
  0x4a   : > { %p1130_p13 = scmp.lt.u32.totalorder %s1397_s27, %s1550_s0  ;;  %p1131_p6 = scmp.lt.u32.totalorder %s1129_s26, %s1124_s25 }
  0x4b   : > { %p1127_p2 = pnand %p1126_p0, %p1125_p12  ;;  %p1133_p3 = scmp.lt.u32.totalorder %s1124_s25, %s1397_s27 }
  0x4c   : > { %p1132_p10 = por %p1131_p6, %p1130_p13 }
  0x4d   : > { %p1128_p1 = pneg %p1127_p2 }
  0x4e   : > { %p1134_p7 = por %p1133_p3, %p1132_p10 }
  0x50   : > { %p1135_p9 = pnand %p1134_p7, %p1128_p1 }
  0x52   : > { %1138 = shalt.err (!%p1135_p9)
}
  0x53   : > { %s1139_s20 = scalar_lea.vmem %s1399_s30, 256  ;;  %s1230_s28 = smov [#allocation3]  }
  0x54   : > { %p1140_p12 = scmp.ne.s32.totalorder %s1399_s30, %s1139_s20  ;;  %s1144_s11 = sshll.u32 %s1230_s28, 4  ;;  %s1145_s11 = int_to_ptr.vmem [resolvable:$false] %s1144_s11 }
  0x55   : > { %s1146_s12 = scalar_lea.vmem %s1145_s11, 512  ;;  %p1147_p4 = scmp.lt.s32.totalorder %s1399_s30, %s1145_s11 }
  0x56   : > { %p1142_p2 = pnand %p1140_p12, %p1126_p0  ;;  %p1148_p13 = scmp.lt.s32.totalorder %s1146_s12, %s1139_s20 }
  0x58   : > { %p1143_p5 = pneg %p1142_p2  ;;  %p1149_p6 = por %p1148_p13, %p1147_p4 }
  0x5a   : > { %p1150_p10 = pnand %p1149_p6, %p1143_p5 }
  0x5c   : > { %1153 = shalt.err (!%p1150_p10)
}
  0x5d   : > { %s1231_s29 = smov 128   ;;  %s1232_s25 = smov 8  }
  0x5e   : > { %986 = dma.hbm_to_vmem [thread:$0]  (!%p1401_p11), %s1397_s27, 256, %s1399_s30, %s1405_s6, %s1231_s29, %s1231_s29, %s1232_s25  }
  0x5f   : > { %206 = sbr.rel (%p1304_p8) target bundleno = 1021 (0x3fd), region = 36  ;;  %s1436_s7 = sand.u32 (!%p1304_p8), 1, %s1216_s16  }
  0x60   : > { %s813_s8 = sshll.u32 (!%p1304_p8), %s1436_s7, 4  ;;  %s209_s26 = scalar_lea.sflag (!%p1304_p8), [#allocation4], %s1436_s7 }
  0x61   : > { %s212_s10 = scalar_lea.vmem (!%p1304_p8), [#allocation3], %s813_s8  ;;  %p1565_p4 = scmp.ne.s32.totalorder (!%p1304_p8), %s1558_s21, 0 }
  0x66   : > { %1199 = dma.done.wait (%p1565_p4), %s209_s26, 256  }
  0x67   : > { %1201 = vsyncadd (%p1565_p4), %s209_s26, 4294967040  ;;  %p1566_p5 = scmp.eq.s32.totalorder %s1285_s19, 0 }
  0x69   : > { %1203 = dma.done.wait (%p1566_p5), [#allocation7], 3584   ;;  %p1567_p8 = pmov %p1566_p5 }
  0x6a   : > { %v1233_v0 = vmov 0.0   ;;  %vm1234_vm0 = vmmov 0   ;;  %v1040_v1 = vld [vmem:[#allocation6] sm:$0xff]   ;;  %v1041_v2 = vld [vmem:[#allocation6 + $0x8] sm:$0xff]   ;;  %vm251_vm1 = vcmask 326656   ;;  %vm253_vm2 = vcmask 523584  }
  0x6b   : > { %1205 = vsyncadd (%p1567_p8), [#allocation7], 4294963712  ;;  %892 = vmatprep.subr.bf16.mxu0 %v1233_v0  ;;  %900 = vmatprep.mubr.msk.bf16.mxu0 %vm1234_vm0, %v1233_v0  ;;  %v248_v3 = vld [vmem:[%s212_s10] sm:$0xff]  ;;  %v249_v4 = vld [vmem:[%s212_s10 + $0x8] sm:$0xff]  ;;  %v1235_v9 = vmov 0   ;;  %vm295_vm3 = vcmask 523264  }
  0x6c   : > { %904 = vmatprep.subr.bf16.mxu1 %v1233_v0  ;;  %920 = vmatprep.mubr.msk.bf16.mxu1 %vm1234_vm0, %v1233_v0  ;;  %v250_v5 = vpack.c.bf16 %v249_v4, %v248_v3  ;;  %v1044_v6 = vld [vmem:[#allocation8] sm:$0xff]   ;;  %v1042_v7 = vld [vmem:[#allocation6 + $0x10] sm:$0xff]   ;;  %v1045_v8 = vld [vmem:[#allocation8 + $0x8] sm:$0xff]   ;;  %s244_s28 = scalar_lea.vmem [#allocation9], %s813_s8  ;;  %s859_s12 = sshll.u32 %s1285_s19, 8 }
  0x6d   : > { %893 = vmatpush3.bf16.msra.mxu0 %v1040_v1  ;;  %905 = vmatpush3.bf16.msra.mxu1 %v1044_v6  ;;  %v1043_v10 = vld [vmem:[#allocation6 + $0x18] sm:$0xff]   ;;  %v1046_v11 = vld [vmem:[#allocation8 + $0x10] sm:$0xff]   ;;  %v1048_v14 = vld [vmem:[#allocation8 + $0x20] sm:$0xff]   ;;  %s712_s11 = sshll.u32 %s244_s28, 4  ;;  %s1506_s26 = scalar_lea.hbm %s1554_s4, %s859_s12  ;;  %s1501_s11 = int_to_ptr.vmem [resolvable:$true] %s712_s11 }
  0x6e   : > { %894 = vmatprep.subr.bf16.mxu0 %v1233_v0  ;;  %252 = vst.msk [vmem:[#allocation2] sm:$0xff] %vm251_vm1, %v250_v5  ;;  %906 = vmatprep.subr.bf16.mxu1 %v1233_v0  ;;  %v1047_v12 = vld [vmem:[#allocation8 + $0x18] sm:$0xff]   ;;  %v1049_v15 = vld [vmem:[#allocation8 + $0x28] sm:$0xff]   ;;  %v1050_v16 = vld [vmem:[#allocation8 + $0x30] sm:$0xff]   ;;  %s699_s8 = scalar_lea.sflag [#allocation5], %s1436_s7  ;;  %s1154_s19 = scalar_lea.vmem %s1501_s11, 256 }
  0x6f   : > { %254 = vst.msk [vmem:[#allocation2] sm:$0xff] %vm253_vm2, %v1235_v9  ;;  %v1051_v17 = vld [vmem:[#allocation8 + $0x38] sm:$0xff]   ;;  %v1052_v18 = vld [vmem:[#allocation8 + $0x40] sm:$0xff]   ;;  %v1053_v19 = vld [vmem:[#allocation8 + $0x48] sm:$0xff]   ;;  %p1155_p11 = scmp.ne.s32.totalorder %s1501_s11, %s1154_s19  ;;  %p1568_p0 = scmp.ne.s32.totalorder %s1563_s13, 0 }
  0x70   : > { %v1054_v20 = vld [vmem:[#allocation8 + $0x50] sm:$0xff]   ;;  %v1055_v21 = vld [vmem:[#allocation8 + $0x58] sm:$0xff]   ;;  %v1056_v22 = vld [vmem:[#allocation8 + $0x60] sm:$0xff]   ;;  %s1236_s10 = smov [#allocation9]  }
  0x71   : > { %895 = vmatpush3.bf16.msra.mxu0 %v1041_v2  ;;  %907 = vmatpush3.bf16.msra.mxu1 %v1045_v8  ;;  %v817_v23 = vld [vmem:[%s1553_s3] ss:$0 sm:$0xff]  ;;  %v1057_v35 = vld [vmem:[#allocation8 + $0x68] sm:$0xff]   ;;  %v1058_v36 = vld [vmem:[#allocation8 + $0x70] sm:$0xff]   ;;  %p1156_p1 = pnand %p1155_p11, %p1568_p0  ;;  %s1158_s21 = sshll.u32 %s1236_s10, 4  ;;  %s1159_s21 = int_to_ptr.vmem [resolvable:$false] %s1158_s21 }
  0x72   : > { %896 = vmatprep.subr.bf16.mxu0 %v1233_v0  ;;  %908 = vmatprep.subr.bf16.mxu1 %v1233_v0  ;;  %v1059_v37 = vld [vmem:[#allocation8 + $0x78] sm:$0xff]   ;;  %v1060_v38 = vld [vmem:[#allocation8 + $0x80] sm:$0xff]   ;;  %v1061_v39 = vld [vmem:[#allocation8 + $0x88] sm:$0xff]   ;;  %s1160_s23 = scalar_lea.vmem %s1159_s21, 512  ;;  %p1161_p7 = scmp.lt.s32.totalorder %s1501_s11, %s1159_s21 }
  0x73   : > { %v1062_v40 = vld [vmem:[#allocation8 + $0x90] sm:$0xff]   ;;  %v1063_v41 = vld [vmem:[#allocation8 + $0x98] sm:$0xff]   ;;  %v1064_v42 = vld [vmem:[#allocation8 + $0xa0] sm:$0xff]   ;;  %p1157_p3 = pneg %p1156_p1  ;;  %p1162_p9 = scmp.lt.s32.totalorder %s1160_s23, %s1154_s19 }
  0x74   : > { %v824_v43 = vld [vmem:[%s1553_s3 + $0x1] ss:$0 sm:$0xff]  ;;  %v1065_v55 = vld [vmem:[#allocation8 + $0xa8] sm:$0xff]   ;;  %v1066_v56 = vld [vmem:[#allocation8 + $0xb0] sm:$0xff]  }
  0x75   : > { %897 = vmatpush3.bf16.msra.mxu0 %v1042_v7  ;;  %909 = vmatpush3.bf16.msra.mxu1 %v1046_v11  ;;  %v1067_v57 = vld [vmem:[#allocation8 + $0xb8] sm:$0xff]   ;;  %p1163_p12 = por %p1162_p9, %p1161_p7 }
  0x76   : > { %898 = vmatprep.subr.bf16.mxu0 %v1233_v0  ;;  %v255_v13 = vld [vmem:[#allocation2] sm:$0xff]  ;;  %910 = vmatprep.subr.bf16.mxu1 %v1233_v0 }
  0x77   : > { %v834_v58 = vld [vmem:[%s1553_s3 + $0x2] ss:$0 sm:$0xff]  ;;  %p1164_p2 = pnand %p1163_p12, %p1157_p3 }
  0x79   : > { %899 = vmatpush3.bf16.msra.mxu0 %v1043_v10  ;;  %911 = vmatpush3.bf16.msra.mxu1 %v1047_v12 }
  0x7a   : > { %924 = vmatprep.subr.bf16.mxu0 %v1233_v0  ;;  %912 = vmatprep.subr.bf16.mxu1 %v1233_v0 }
  0x7c   : > { %901 = vmatmul.mubr.msk.bf16.vlgmr.msra.gmra.mrb[0].mxu0 %vm295_vm3, %v255_v13 }
  0x7d   : > { %940 = vmatprep.mubr.msk.bf16.mxu0 %vm1234_vm0, %v1233_v0  ;;  %913 = vmatpush3.bf16.msra.mxu1 %v1048_v14 }
  0x7e   : > { %914 = vmatprep.subr.bf16.mxu1 %v1233_v0  ;;  %925 = vmatpush3.bf16.msra.mxu0 %v1052_v18 }
  0x7f   : > { %926 = vmatprep.subr.bf16.mxu0 %v1233_v0 }
  0x81   : > { %915 = vmatpush3.bf16.msra.mxu1 %v1049_v15 }
  0x82   : > { %916 = vmatprep.subr.bf16.mxu1 %v1233_v0  ;;  %927 = vmatpush3.bf16.msra.mxu0 %v1053_v19 }
  0x83   : > { %928 = vmatprep.subr.bf16.mxu0 %v1233_v0 }
  0x85   : > { %917 = vmatpush3.bf16.msra.mxu1 %v1050_v16 }
  0x86   : > { %918 = vmatprep.subr.bf16.mxu1 %v1233_v0  ;;  %929 = vmatpush3.bf16.msra.mxu0 %v1054_v20 }
  0x87   : > { %930 = vmatprep.subr.bf16.mxu0 %v1233_v0 }
  0x89   : > { %919 = vmatpush3.bf16.msra.mxu1 %v1051_v17 }
  0x8a   : > { %944 = vmatprep.subr.bf16.mxu1 %v1233_v0  ;;  %931 = vmatpush3.bf16.msra.mxu0 %v1055_v21 }
  0x8b   : > { %932 = vmatprep.subr.bf16.mxu0 %v1233_v0 }
  0x8e   : > { %933 = vmatpush3.bf16.msra.mxu0 %v1056_v22 }
  0x8f   : > { %934 = vmatprep.subr.bf16.mxu0 %v1233_v0 }
  0x92   : > { %935 = vmatpush3.bf16.msra.mxu0 %v1057_v35 }
  0x93   : > { %936 = vmatprep.subr.bf16.mxu0 %v1233_v0 }
  0x96   : > { %937 = vmatpush3.bf16.msra.mxu0 %v1058_v36 }
  0x97   : > { %938 = vmatprep.subr.bf16.mxu0 %v1233_v0 }
  0x9a   : > { %939 = vmatpush3.bf16.msra.mxu0 %v1059_v37 }
 0x14f   : > { %v333_v24 = vpop.f32.mrb[0].mxu0 }
 0x150   : > { %v334_v25 = vadd.f32 %v817_v23, %v333_v24  ;;  %v902_v26 = vpop.f32.mrb[1].mxu0 }
 0x151   : > { %v336_v27 = vpop.f32.mrb[2].mxu0 }
 0x152   : > { %v340_v28 = vmul.f32 0.1, %v334_v25  ;;  %v337_v29 = vadd.f32 %v817_v23, %v336_v27  ;;  %v903_v30 = vpop.f32.mrb[3].mxu0 }
 0x154   : > { %v341_v31 = vmul.f32 0.1, %v337_v29  ;;  %v342_v32 = vmax.f32 %v334_v25, %v340_v28 }
 0x156   : > { %v343_v33 = vmax.f32 %v337_v29, %v341_v31 }
 0x158   : > { %v344_v34 = vpack.c.bf16 %v343_v33, %v342_v32 }
 0x15a   : > { %921 = vmatmul.mubr.bf16.vlgmr.msra.gmra.mrb[0].mxu1 %v344_v34 }
 0x15b   : > { %960 = vmatprep.mubr.msk.bf16.mxu1 %vm1234_vm0, %v1233_v0  ;;  %945 = vmatpush3.bf16.msra.mxu1 %v1060_v38 }
 0x15c   : > { %946 = vmatprep.subr.bf16.mxu1 %v1233_v0 }
 0x15f   : > { %947 = vmatpush3.bf16.msra.mxu1 %v1061_v39 }
 0x160   : > { %948 = vmatprep.subr.bf16.mxu1 %v1233_v0 }
 0x163   : > { %949 = vmatpush3.bf16.msra.mxu1 %v1062_v40 }
 0x164   : > { %950 = vmatprep.subr.bf16.mxu1 %v1233_v0 }
 0x167   : > { %951 = vmatpush3.bf16.msra.mxu1 %v1063_v41 }
 0x168   : > { %952 = vmatprep.subr.bf16.mxu1 %v1233_v0 }
 0x16b   : > { %953 = vmatpush3.bf16.msra.mxu1 %v1064_v42 }
 0x16c   : > { %954 = vmatprep.subr.bf16.mxu1 %v1233_v0 }
 0x16f   : > { %955 = vmatpush3.bf16.msra.mxu1 %v1065_v55 }
 0x170   : > { %956 = vmatprep.subr.bf16.mxu1 %v1233_v0 }
 0x173   : > { %957 = vmatpush3.bf16.msra.mxu1 %v1066_v56 }
 0x174   : > { %958 = vmatprep.subr.bf16.mxu1 %v1233_v0  ;;  %v844_v0 = vld [vmem:[%s1553_s3 + $0x3] ss:$0 sm:$0xff] }
 0x177   : > { %959 = vmatpush3.bf16.msra.mxu1 %v1067_v57 }
 0x22d   : > { %v451_v44 = vpop.f32.mrb[0].mxu1 }
 0x22e   : > { %v452_v45 = vadd.f32 %v824_v43, %v451_v44  ;;  %v922_v46 = vpop.f32.mrb[1].mxu1 }
 0x22f   : > { %v454_v47 = vpop.f32.mrb[2].mxu1 }
 0x230   : > { %v458_v48 = vmul.f32 0.1, %v452_v45  ;;  %v455_v49 = vadd.f32 %v824_v43, %v454_v47  ;;  %v923_v50 = vpop.f32.mrb[3].mxu1 }
 0x232   : > { %v459_v51 = vmul.f32 0.1, %v455_v49  ;;  %v460_v52 = vmax.f32 %v452_v45, %v458_v48 }
 0x234   : > { %v461_v53 = vmax.f32 %v455_v49, %v459_v51 }
 0x236   : > { %v462_v54 = vpack.c.bf16 %v461_v53, %v460_v52 }
 0x238   : > { %941 = vmatmul.mubr.bf16.vlgmr.msra.gmra.mrb[4].mxu0 %v462_v54 }
 0x30b   : > { %v570_v59 = vpop.f32.mrb[4].mxu0 }
 0x30c   : > { %v571_v60 = vadd.f32 %v834_v58, %v570_v59  ;;  %v942_v61 = vpop.f32.mrb[5].mxu0 }
 0x30d   : > { %v573_v62 = vpop.f32.mrb[6].mxu0 }
 0x30e   : > { %v577_v63 = vmul.f32 0.1, %v571_v60  ;;  %v574_v1 = vadd.f32 %v834_v58, %v573_v62  ;;  %v943_v2 = vpop.f32.mrb[7].mxu0 }
 0x310   : > { %v578_v3 = vmul.f32 0.1, %v574_v1  ;;  %v579_v4 = vmax.f32 %v571_v60, %v577_v63 }
 0x312   : > { %v580_v5 = vmax.f32 %v574_v1, %v578_v3 }
 0x314   : > { %v581_v6 = vpack.c.bf16 %v580_v5, %v579_v4 }
 0x316   : > { %961 = vmatmul.mubr.bf16.vlgmr.msra.gmra.mrb[4].mxu1 %v581_v6 }
 0x3e9   : > { %v689_v7 = vpop.f32.mrb[4].mxu1 }
 0x3ea   : > { %v690_v8 = vadd.f32 %v844_v0, %v689_v7  ;;  %v962_v9 = vpop.f32.mrb[5].mxu1 }
 0x3eb   : > { %v692_v10 = vpop.f32.mrb[6].mxu1 }
 0x3ec   : > { %696 = vst [vmem:[%s244_s28] sm:$0xff] %v690_v8  ;;  %v693_v11 = vadd.f32 %v844_v0, %v692_v10  ;;  %v963_v12 = vpop.f32.mrb[7].mxu1 }
 0x3ee   : > { %697 = vst [vmem:[%s244_s28 + $0x8] sm:$0xff] %v693_v11 }
 0x3ef   : > { %1167 = shalt.err (!%p1164_p2)
}
 0x3f0   : > { %s1168_s27 = scalar_lea.hbm %s1506_s26, 256  ;;  %s1172_s6 = scalar_lea.hbm %s1554_s4, 512 }
 0x3f1   : > { %p1169_p13 = scmp.ne.s32.totalorder %s1506_s26, %s1168_s27  ;;  %p1173_p4 = scmp.lt.u32.totalorder %s1506_s26, %s1554_s4 }
 0x3f2   : > { %p1174_p5 = scmp.lt.u32.totalorder %s1172_s6, %s1168_s27  ;;  %p1176_p11 = scmp.lt.u32.totalorder %s1168_s27, %s1506_s26 }
 0x3f3   : > { %p1170_p6 = pnand %p1169_p13, %p1568_p0 }
 0x3f4   : > { %p1175_p8 = por %p1174_p5, %p1173_p4 }
 0x3f5   : > { %p1171_p10 = pneg %p1170_p6 }
 0x3f6   : > { %p1177_p1 = por %p1176_p11, %p1175_p8 }
 0x3f8   : > { %p1178_p3 = pnand %p1177_p1, %p1171_p10 }
 0x3fa   : > { %1181 = shalt.err (!%p1178_p3)
}
 0x3fb   : > { %s1237_s28 = smov 128   ;;  %s1238_s12 = smov 8  }
 0x3fc   : > { %974 = dma.vmem_to_hbm [thread:$0]  (%p1568_p0), %s1501_s11, 256, %s1506_s26, %s699_s8, %s1237_s28, %s1237_s28, %s1238_s12  }
 0x3fd PF: > { %s727_s29 = sand.u32 1, %s1212_s15   ;;  %p1569_p7 = scmp.ne.s32.totalorder %s1559_s22, 0 }
 0x3fe   : > { %p1570_p9 = scmp.ge.s32.totalorder %s1224_s18, 2  ;;  %s728_s25 = scalar_lea.sflag [#allocation5], %s727_s29 }
 0x400   : > { %p988_p12 = pnand %p1570_p9, %p1569_p7 }
 0x402   : > { %1207 = dma.done.wait (!%p988_p12), %s728_s25, 256  }
 0x403   : > { %1209 = vsyncadd (!%p988_p12), %s728_s25, 4294967040  ;;  %p18_p2 = scmp.ge.s32.totalorder %s1374_s9, 4   ;;  %s1571_s15 = smov %s1216_s16 }
 0x404   : > { %s1572_s16 = smov %s1220_s17  ;;  %s1573_s17 = smov %s1390_s14 }
 0x405   : > { %s1574_s18 = smov %s1374_s9  ;;  %20 = sbr.rel (!%p18_p2) target bundleno = 6 (0x6), region = 94 }
 0x40c   :  { %733 = vsyncpa [#allocation4], 1 }
 0x40d   :  { %735 = vsyncpa [#allocation4 + $0x1], 1 }
 0x40e   :  { %736 = vsyncpa [#allocation7], 1 }
 0x40f   :  { %737 = vsyncpa [#allocation5], 1 }
 0x410   :  { %739 = vsyncpa [#allocation5 + $0x1], 1 }

</bundles_post_ra>
